<compile_context>
chip_gen: v5e
topology: v5e:2x2
jax: 0.10.0
libtpu: 0.0.40
codegen_flags: <defaults>
</compile_context>

<pallas_src>
import functools
import math

import jax
import jax.numpy as jnp
from jax.experimental import pallas as pl
from jax.experimental.pallas import tpu as pltpu


def _round_up(x, m):
    return (x + m - 1) // m * m


def _cdiv(a, b):
    return (a + b - 1) // b


def _gelu_tanh_f32(g):
    # tanh-approximate GELU computed in f32 (tanh goes to the EUP slot).
    # TODO(synk): torch F.gelu defaults to the exact erf form; the tanh approximation is
    # used here (max abs diff ~1e-3) because erf has no guaranteed Mosaic lowering.
    c = math.sqrt(2.0 / math.pi)
    return 0.5 * g * (1.0 + jnp.tanh(c * (g + 0.044715 * g * g * g)))


def _geglu_kernel(x_ref, w_ref, b_ref, o_ref, acc_ref, *, bn):
    """Grid = (N tiles, M tiles, K tiles); K (reduction) is the last/innermost axis.

    x_ref:   (bm, bk)      compute dtype
    w_ref:   (bk, 2*bn)    compute dtype; lanes [0:bn) = value half, [bn:2bn) = gate half
    b_ref:   (1, 2*bn)     f32, same lane layout as w_ref
    o_ref:   (bm, bn)      output dtype
    acc_ref: (bm, 2*bn)    f32 accumulator scratch (persists across the K axis)
    """
    k = pl.program_id(2)

    @pl.when(k == 0)
    def _():
        acc_ref[...] = jnp.zeros_like(acc_ref)

    # One fused (bm, bk) x (bk, 2*bn) MXU matmul, accumulating in f32.
    acc_ref[...] += jnp.dot(x_ref[...], w_ref[...], preferred_element_type=jnp.float32)

    @pl.when(k == pl.num_programs(2) - 1)
    def _():
        acc = acc_ref[...] + b_ref[...]       # bias add in f32
        h = acc[:, :bn]                       # value half (lane-aligned static slice)
        g = acc[:, bn:]                       # gate half
        o_ref[...] = (h * _gelu_tanh_f32(g)).astype(o_ref.dtype)


def geglu_proj(x, w, b, *, block_m=256, block_n=512, block_k=2048,
               compute_dtype=jnp.bfloat16):
    """GEGLU projection.

    x: (..., in_dim)
    w: (in_dim, 2*out_dim)   (transpose of torch nn.Linear.weight, i.e. y = x @ w + b)
    b: (2*out_dim,)
    returns: (..., out_dim) = (x @ w_x + b_x) * gelu(x @ w_g + b_g)
    """
    orig_dtype = x.dtype
    *lead, in_dim = x.shape
    out_dim = w.shape[1] // 2
    M = math.prod(lead) if lead else 1

    # ---- tile sizes -------------------------------------------------------------------
    # K (contraction): lane-aligned; blocked so VMEM does not scale with in_dim.
    K_pad = _round_up(in_dim, 128)
    bk = _round_up(_cdiv(K_pad, _cdiv(K_pad, block_k)), 128)
    K_pad = _round_up(K_pad, bk)
    # N (output features): lane-aligned.
    N_pad = _round_up(max(out_dim, 1), 128)
    bn = _round_up(_cdiv(N_pad, _cdiv(N_pad, block_n)), 128)
    N_pad = _round_up(N_pad, bn)
    # M (tokens): multiple of 16 for bf16 sublane packing.
    M_r = _round_up(max(M, 1), 16)
    bm = min(block_m, M_r)
    M_pad = _round_up(M_r, bm)
    n_n, n_m, n_k = N_pad // bn, M_pad // bm, K_pad // bk

    # ---- operand preparation (weights/biases would be pre-fused once in production) ----
    w_x, w_g = w[:, :out_dim], w[:, out_dim:]
    b_x, b_g = b[:out_dim], b[out_dim:]

    def _prep_w(h):
        h = h.astype(compute_dtype)
        if h.shape != (K_pad, N_pad):
            h = jnp.pad(h, ((0, K_pad - in_dim), (0, N_pad - out_dim)))
        return h.reshape(K_pad, n_n, bn)

    # Interleave value/gate halves at bn-tile granularity so a single (bk, 2*bn) block per
    # grid step carries the matching value+gate weight tiles (one DMA, one fused dot).
    w_fused = jnp.concatenate([_prep_w(w_x), _prep_w(w_g)], axis=2).reshape(K_pad, 2 * N_pad)

    def _prep_b(v):
        v = v.astype(jnp.float32)
        if v.shape[0] != N_pad:
            v = jnp.pad(v, (0, N_pad - out_dim))
        return v.reshape(n_n, bn)

    b_fused = jnp.concatenate([_prep_b(b_x), _prep_b(b_g)], axis=1).reshape(1, 2 * N_pad)

    # Activations: cast + pad in one wrapper pass.  The K-tail padding is kept explicit so
    # no uninitialized values can reach the accumulator.
    x2 = x.reshape(M, in_dim).astype(compute_dtype)
    if M_pad != M or K_pad != in_dim:
        x2 = jnp.pad(x2, ((0, M_pad - M), (0, K_pad - in_dim)))

    grid = (n_n, n_m, n_k)

    flops = 2 * M * in_dim * (2 * out_dim)
    bytes_accessed = int(
        x2.size * x2.dtype.itemsize
        + w_fused.size * w_fused.dtype.itemsize
        + b_fused.size * 4
        + M_pad * N_pad * jnp.dtype(orig_dtype).itemsize
    )

    out = pl.pallas_call(
        functools.partial(_geglu_kernel, bn=bn),
        out_shape=jax.ShapeDtypeStruct((M_pad, N_pad), orig_dtype),
        grid_spec=pltpu.PrefetchScalarGridSpec(
            num_scalar_prefetch=0,
            grid=grid,
            in_specs=[
                pl.BlockSpec((bm, bk), lambda j, i, k: (i, k)),         # x tile
                pl.BlockSpec((bk, 2 * bn), lambda j, i, k: (k, j)),     # fused value|gate weights
                pl.BlockSpec((1, 2 * bn), lambda j, i, k: (0, j)),      # fused value|gate bias
            ],
            out_specs=pl.BlockSpec((bm, bn), lambda j, i, k: (i, j)),
            scratch_shapes=[pltpu.VMEM((bm, 2 * bn), jnp.float32)],     # f32 accumulator
        ),
        compiler_params=pltpu.CompilerParams(
            # N and M tiles are independent -> megacore can shard either on v7x;
            # the K reduction axis is last and "arbitrary".
            dimension_semantics=("parallel", "parallel", "arbitrary"),
            # Budget valid on v5e/v6e (128 MiB physical) and v7x (64 MiB physical).
            vmem_limit_bytes=48 * 1024 * 1024,
        ),
        cost_estimate=pl.CostEstimate(
            flops=flops,
            transcendentals=M * out_dim,
            bytes_accessed=bytes_accessed,
        ),
    )(x2, w_fused, b_fused)

    out = out[:M, :out_dim]
    return out.reshape(*lead, out_dim)


def _reference(x, w, b):
    """Pure-JAX reference mirroring the PyTorch forward (tanh-approx GELU, see TODO above)."""
    proj = x @ w + b
    h, g = jnp.split(proj, 2, axis=-1)
    return h * jax.nn.gelu(g, approximate=True)


if __name__ == "__main__":
    key = jax.random.PRNGKey(0)

    # --- main check: module-sized small shapes, bf16 MXU path ---------------------------
    kx, kw, kb = jax.random.split(key, 3)
    B, T, in_dim, out_dim = 2, 8, 32, 64
    x = jax.random.normal(kx, (B, T, in_dim), jnp.float32)
    bound = 1.0 / math.sqrt(in_dim)  # nn.Linear default init range
    w = jax.random.uniform(kw, (in_dim, 2 * out_dim), jnp.float32, -bound, bound)
    b = jax.random.uniform(kb, (2 * out_dim,), jnp.float32, -bound, bound)

    out = jax.block_until_ready(geglu_proj(x, w, b))
    ref = _reference(x, w, b)
    assert out.shape == (B, T, out_dim), out.shape
    # bf16 matmul operands (f32 accumulation) vs. full-f32 reference -> loose tolerance.
    assert jnp.allclose(out, ref, atol=2e-2, rtol=2e-2), float(jnp.max(jnp.abs(out - ref)))

    # --- multi-tile check: exercises M/N/K tiling + K accumulator, f32 for tight bound --
    kx2, kw2, kb2 = jax.random.split(jax.random.PRNGKey(1), 3)
    B2, T2, in2, out2 = 2, 16, 256, 256
    x2 = jax.random.normal(kx2, (B2, T2, in2), jnp.float32)
    bound2 = 1.0 / math.sqrt(in2)
    w2 = jax.random.uniform(kw2, (in2, 2 * out2), jnp.float32, -bound2, bound2)
    b2 = jax.random.uniform(kb2, (2 * out2,), jnp.float32, -bound2, bound2)

    out2_k = jax.block_until_ready(
        geglu_proj(x2, w2, b2, block_m=16, block_n=128, block_k=128,
                   compute_dtype=jnp.float32))
    ref2 = _reference(x2, w2, b2)
    assert out2_k.shape == (B2, T2, out2), out2_k.shape
    assert jnp.allclose(out2_k, ref2, atol=1e-4, rtol=1e-4), \
        float(jnp.max(jnp.abs(out2_k - ref2)))

    print("KERNEL_OK")
</pallas_src>

<mosaic_0001>
module attributes {stable_mosaic.version = 11 : i64} {
  func.func @_geglu_kernel(%arg0: i32, %arg1: i32, %arg2: i32, %arg3: memref<16x128xbf16, #tpu.memory_space<vmem>>, %arg4: memref<128x256xbf16, #tpu.memory_space<vmem>>, %arg5: memref<1x256xf32, #tpu.memory_space<vmem>>, %arg6: memref<16x128xf32, #tpu.memory_space<vmem>>, %arg7: memref<16x256xf32, #tpu.memory_space<vmem>>) attributes {dimension_semantics = [#tpu.dimension_semantics<parallel>, #tpu.dimension_semantics<parallel>, #tpu.dimension_semantics<arbitrary>], iteration_bounds = array<i64: 1, 1, 1>, scalar_prefetch = 0 : i64, scratch_operands = 1 : i64, tpu.core_type = #tpu.core_type<tc>, window_params = [{transform_indices = @transform_0, window_bounds = array<i64: 16, 128>}, {transform_indices = @transform_1, window_bounds = array<i64: 128, 256>}, {transform_indices = @transform_2, window_bounds = array<i64: 1, 256>}, {transform_indices = @transform_3, window_bounds = array<i64: 16, 128>}]} {
    %c0_i32 = arith.constant 0 : i32
    %0 = arith.cmpi eq, %arg2, %c0_i32 : i32
    %1 = arith.extui %0 : i1 to i32
    %c0_i32_0 = arith.constant 0 : i32
    %2 = arith.cmpi ne, %1, %c0_i32_0 : i32
    scf.if %2 {
      %cst_10 = arith.constant 0.000000e+00 : f32
      %12 = vector.broadcast %cst_10 : f32 to vector<16x256xf32>
      %c0_11 = arith.constant 0 : index
      %c0_12 = arith.constant 0 : index
      %13 = vector.load %arg7[%c0_11, %c0_12] : memref<16x256xf32, #tpu.memory_space<vmem>>, vector<16x256xf32>
      tpu.vector_store %arg7[%c0_11, %c0_12], %12 {strides = array<i32>} : memref<16x256xf32, #tpu.memory_space<vmem>>, vector<16x256xf32>,
    } else {
    }
    %c0 = arith.constant 0 : index
    %c0_1 = arith.constant 0 : index
    %3 = vector.load %arg7[%c0, %c0_1] : memref<16x256xf32, #tpu.memory_space<vmem>>, vector<16x256xf32>
    %c0_2 = arith.constant 0 : index
    %c0_3 = arith.constant 0 : index
    %4 = vector.load %arg3[%c0_2, %c0_3] : memref<16x128xbf16, #tpu.memory_space<vmem>>, vector<16x128xbf16>
    %c0_4 = arith.constant 0 : index
    %c0_5 = arith.constant 0 : index
    %5 = vector.load %arg4[%c0_4, %c0_5] : memref<128x256xbf16, #tpu.memory_space<vmem>>, vector<128x256xbf16>
    %cst = arith.constant dense<0.000000e+00> : vector<16x256xf32>
    %6 = tpu.matmul %4, %5, %cst {dimension_numbers = #tpu.dot_dimension_numbers<[1], [0], [0], [1], [0, 0, 1, 1], [], []>} : vector<16x128xbf16>, vector<128x256xbf16>, vector<16x256xf32> -> vector<16x256xf32>
    %7 = arith.addf %3, %6 : vector<16x256xf32>
    %c0_6 = arith.constant 0 : index
    %c0_7 = arith.constant 0 : index
    %8 = vector.load %arg7[%c0_6, %c0_7] : memref<16x256xf32, #tpu.memory_space<vmem>>, vector<16x256xf32>
    tpu.vector_store %arg7[%c0_6, %c0_7], %7 {strides = array<i32>} : memref<16x256xf32, #tpu.memory_space<vmem>>, vector<16x256xf32>,
    %c0_i32_8 = arith.constant 0 : i32
    %9 = arith.cmpi eq, %arg2, %c0_i32_8 : i32
    %10 = arith.extui %9 : i1 to i32
    %c0_i32_9 = arith.constant 0 : i32
    %11 = arith.cmpi ne, %10, %c0_i32_9 : i32
    scf.if %11 {
      %c0_10 = arith.constant 0 : index
      %c0_11 = arith.constant 0 : index
      %12 = vector.load %arg7[%c0_10, %c0_11] : memref<16x256xf32, #tpu.memory_space<vmem>>, vector<16x256xf32>
      %c0_12 = arith.constant 0 : index
      %c0_13 = arith.constant 0 : index
      %13 = vector.load %arg5[%c0_12, %c0_13] : memref<1x256xf32, #tpu.memory_space<vmem>>, vector<1x256xf32>
      %14 = vector.broadcast %13 : vector<1x256xf32> to vector<16x256xf32>
      %15 = arith.addf %12, %14 : vector<16x256xf32>
      %16 = vector.extract_strided_slice %15 {offsets = [0, 0], sizes = [16, 128], strides = [1, 1]} : vector<16x256xf32> to vector<16x128xf32>
      %17 = vector.extract_strided_slice %15 {offsets = [0, 128], sizes = [16, 128], strides = [1, 1]} : vector<16x256xf32> to vector<16x128xf32>
      %cst_14 = arith.constant 5.000000e-01 : f32
      %18 = vector.broadcast %cst_14 : f32 to vector<16x128xf32>
      %19 = arith.mulf %18, %17 : vector<16x128xf32>
      %cst_15 = arith.constant 4.471500e-02 : f32
      %20 = vector.broadcast %cst_15 : f32 to vector<16x128xf32>
      %21 = arith.mulf %20, %17 : vector<16x128xf32>
      %22 = arith.mulf %21, %17 : vector<16x128xf32>
      %23 = arith.mulf %22, %17 : vector<16x128xf32>
      %24 = arith.addf %17, %23 : vector<16x128xf32>
      %cst_16 = arith.constant 0.797884583 : f32
      %25 = vector.broadcast %cst_16 : f32 to vector<16x128xf32>
      %26 = arith.mulf %25, %24 : vector<16x128xf32>
      %27 = math.tanh %26 : vector<16x128xf32>
      %cst_17 = arith.constant 1.000000e+00 : f32
      %28 = vector.broadcast %cst_17 : f32 to vector<16x128xf32>
      %29 = arith.addf %28, %27 : vector<16x128xf32>
      %30 = arith.mulf %19, %29 : vector<16x128xf32>
      %31 = arith.mulf %16, %30 : vector<16x128xf32>
      %c0_18 = arith.constant 0 : index
      %c0_19 = arith.constant 0 : index
      %32 = vector.load %arg6[%c0_18, %c0_19] : memref<16x128xf32, #tpu.memory_space<vmem>>, vector<16x128xf32>
      tpu.vector_store %arg6[%c0_18, %c0_19], %31 {strides = array<i32>} : memref<16x128xf32, #tpu.memory_space<vmem>>, vector<16x128xf32>,
    } else {
    }
    return
  }
  func.func @transform_0(%arg0: i32, %arg1: i32, %arg2: i32) -> (i32, i32) {
    %c0_i32 = arith.constant 0 : i32
    return %arg1, %arg2 : i32, i32
  }
  func.func @transform_1(%arg0: i32, %arg1: i32, %arg2: i32) -> (i32, i32) {
    %c0_i32 = arith.constant 0 : i32
    return %arg2, %arg0 : i32, i32
  }
  func.func @transform_2(%arg0: i32, %arg1: i32, %arg2: i32) -> (i32, i32) {
    %c0_i32 = arith.constant 0 : i32
    %c0_i32_0 = arith.constant 0 : i32
    return %c0_i32, %arg0 : i32, i32
  }
  func.func @transform_3(%arg0: i32, %arg1: i32, %arg2: i32) -> (i32, i32) {
    %c0_i32 = arith.constant 0 : i32
    return %arg1, %arg0 : i32, i32
  }
}

</mosaic_0001>

<bundles_post_ra>
// kernel: tpu_custom_call.1
= control target key start
LH: loop header
LB: loop body
LE: loop exit
PB: predicated region body
PF: predicated region fallthrough
CT: control target
= control target key end

     0   :  { %8 = vsyncpa [#allocation4], 0  ;;  %s516_s0 = inlined_call_operand.hbm [shape: bf16[16,128], index: 0, kind: input, shape index: {}]   ;;  %s517_s1 = inlined_call_operand.hbm [shape: bf16[128,256], index: 1, kind: input, shape index: {}]   ;;  %s518_s2 = inlined_call_operand.hbm [shape: f32[1,256], index: 2, kind: input, shape index: {}]   ;;  %s519_s3 = inlined_call_operand.hbm [shape: f32[16,128], index: 3, kind: output, shape index: {}]  }
   0x1   :  { %9 = vsyncpa [#allocation7], 0  ;;  %s28_s14 = sshll.u32 %s517_s1, 4  ;;  %s29_s14 = int_to_ptr.hbm [resolvable:$true] %s28_s14 }
   0x2   :  { %10 = vsyncpa [#allocation5], 0  ;;  %s470_s15 = smov [#allocation6]   ;;  %s15_s19 = sshll.u32 %s516_s0, 4  ;;  %s16_s19 = int_to_ptr.hbm [resolvable:$true] %s15_s19 }
   0x3   :  { %s30_s16 = sshll.u32 %s470_s15, 4  ;;  %s471_s20 = smov 128   ;;  %s31_s16 = int_to_ptr.vmem [resolvable:$true] %s30_s16 }
   0x4   :  { %s472_s21 = smov 8   ;;  %s473_s22 = smov [#allocation3]  }
   0x5   :  { %36 = dma.hbm_to_vmem [thread:$0]  %s29_s14, 2048, %s31_s16, [#allocation7], %s471_s20, %s471_s20, %s472_s21  }
   0x6   :  { %s17_s23 = sshll.u32 %s473_s22, 4  ;;  %s474_s1 = smov 64   ;;  %s18_s23 = int_to_ptr.vmem [resolvable:$true] %s17_s23 }
   0x7   :  { %s475_s24 = smov 4   ;;  %s42_s27 = sshll.u32 %s518_s2, 4  ;;  %s43_s27 = int_to_ptr.hbm [resolvable:$true] %s42_s27 }
   0x8   :  { %23 = dma.hbm_to_vmem [thread:$0]  %s16_s19, 128, %s18_s23, [#allocation4], %s474_s1, %s474_s1, %s475_s24  }
   0x9   :  { %s476_s28 = smov [#allocation8]  }
   0xa   :  { %s44_s0 = sshll.u32 %s476_s28, 4  ;;  %s45_s0 = int_to_ptr.vmem [resolvable:$true] %s44_s0 }
   0xb   :  { %47 = dma.hbm_to_vmem [thread:$0]  %s43_s27, 32, %s45_s0, [#allocation7]  }
   0xc   :  { %464 = dma.done.wait [#allocation4], 128  }
   0xd   :  { %465 = vsyncadd [#allocation4], 4294967168 }
   0xe   :  { %466 = dma.done.wait [#allocation7], 2080  }
   0xf   :  { %467 = vsyncadd [#allocation7], 4294965216  ;;  %v354_v0 = vld [vmem:[#allocation6 + $0x74] sm:$0xf]  ;;  %v335_v1 = vld [vmem:[#allocation6 + $0x78] sm:$0xf0] }
  0x10   :  { %v352_v2 = vld [vmem:[#allocation6 + $0x64] sm:$0xf]  ;;  %v338_v3 = vor.u32 %v354_v0, %v335_v1  ;;  %v327_v4 = vld [vmem:[#allocation6 + $0x68] sm:$0xf0]  ;;  %v333_v5 = vld [vmem:[#allocation6 + $0x70] sm:$0xf] }
  0x11   :  { %v330_v6 = vor.u32 %v352_v2, %v327_v4  ;;  %v350_v7 = vld [vmem:[#allocation6 + $0x54] sm:$0xf]  ;;  %v355_v8 = vld [vmem:[#allocation6 + $0x74] sm:$0xf0]  ;;  %v319_v9 = vld [vmem:[#allocation6 + $0x58] sm:$0xf0] }
  0x12   :  { %190 = vmatpush.bf16.msra.mxu1 %v338_v3  ;;  %v334_v10 = vor.u32 %v355_v8, %v333_v5  ;;  %v325_v11 = vld [vmem:[#allocation6 + $0x60] sm:$0xf]  ;;  %v353_v12 = vld [vmem:[#allocation6 + $0x64] sm:$0xf0]  ;;  %v322_v14 = vor.u32 %v350_v7, %v319_v9  ;;  %v317_v15 = vld [vmem:[#allocation6 + $0x50] sm:$0xf] }
  0x13   :  { %v326_v13 = vor.u32 %v353_v12, %v325_v11  ;;  %v351_v16 = vld [vmem:[#allocation6 + $0x54] sm:$0xf0]  ;;  %v348_v17 = vld [vmem:[#allocation6 + $0x44] sm:$0xf]  ;;  %v311_v18 = vld [vmem:[#allocation6 + $0x48] sm:$0xf0] }
  0x14   :  { %176 = vmatpush.bf16.msra.mxu0 %v334_v10  ;;  %v318_v19 = vor.u32 %v351_v16, %v317_v15  ;;  %v314_v20 = vor.u32 %v348_v17, %v311_v18  ;;  %v309_v21 = vld [vmem:[#allocation6 + $0x40] sm:$0xf]  ;;  %v349_v22 = vld [vmem:[#allocation6 + $0x44] sm:$0xf0]  ;;  %v346_v23 = vld [vmem:[#allocation6 + $0x34] sm:$0xf] }
  0x15   :  { %v303_v24 = vld [vmem:[#allocation6 + $0x38] sm:$0xf0]  ;;  %v310_v25 = vor.u32 %v349_v22, %v309_v21  ;;  %v301_v27 = vld [vmem:[#allocation6 + $0x30] sm:$0xf]  ;;  %v347_v28 = vld [vmem:[#allocation6 + $0x34] sm:$0xf0] }
  0x16   :  { %191 = vmatpush.bf16.msra.mxu1 %v330_v6  ;;  %v306_v26 = vor.u32 %v346_v23, %v303_v24  ;;  %v344_v29 = vld [vmem:[#allocation6 + $0x24] sm:$0xf]  ;;  %v295_v30 = vld [vmem:[#allocation6 + $0x28] sm:$0xf0]  ;;  %v302_v31 = vor.u32 %v347_v28, %v301_v27  ;;  %v293_v33 = vld [vmem:[#allocation6 + $0x20] sm:$0xf] }
  0x17   :  { %v298_v32 = vor.u32 %v344_v29, %v295_v30  ;;  %v345_v34 = vld [vmem:[#allocation6 + $0x24] sm:$0xf0]  ;;  %v342_v35 = vld [vmem:[#allocation6 + $0x14] sm:$0xf]  ;;  %v287_v36 = vld [vmem:[#allocation6 + $0x18] sm:$0xf0] }
  0x18   :  { %177 = vmatpush.bf16.msra.mxu0 %v326_v13  ;;  %v294_v37 = vor.u32 %v345_v34, %v293_v33  ;;  %v290_v38 = vor.u32 %v342_v35, %v287_v36  ;;  %v285_v39 = vld [vmem:[#allocation6 + $0x10] sm:$0xf]  ;;  %v343_v40 = vld [vmem:[#allocation6 + $0x14] sm:$0xf0]  ;;  %v340_v41 = vld [vmem:[#allocation6 + $0x4] sm:$0xf] }
  0x19   :  { %v279_v42 = vld [vmem:[#allocation6 + $0x8] sm:$0xf0]  ;;  %v286_v43 = vor.u32 %v343_v40, %v285_v39  ;;  %v277_v45 = vld [vmem:[#allocation6] sm:$0xf]  ;;  %v341_v46 = vld [vmem:[#allocation6 + $0x4] sm:$0xf0] }
  0x1a   :  { %192 = vmatpush.bf16.msra.mxu1 %v322_v14  ;;  %v282_v44 = vor.u32 %v340_v41, %v279_v42  ;;  %v339_v47 = vld [vmem:[#allocation3] sm:$0xff]  ;;  %v278_v48 = vor.u32 %v341_v46, %v277_v45  ;;  %v219_v49 = vld [vmem:[#allocation8] sm:$0x3]  ;;  %s477_s2 = smov [#allocation9]   ;;  %s257_s5 = sshll.u32 %s519_s3, 4  ;;  %s258_s5 = int_to_ptr.hbm [resolvable:$true] %s257_s5 }
  0x1b   :  { %v222_v50 = vperm.slane %v219_v49, 1  ;;  %v221_v63 = vperm.slane %v219_v49, 0  ;;  %s255_s29 = sshll.u32 %s477_s2, 4  ;;  %s256_s29 = int_to_ptr.vmem [resolvable:$true] %s255_s29 }
  0x1c   :  { %178 = vmatpush.bf16.msra.mxu0 %v318_v19 }
  0x1e   :  { %193 = vmatpush.bf16.msra.mxu1 %v314_v20 }
  0x20   :  { %179 = vmatpush.bf16.msra.mxu0 %v310_v25 }
  0x22   :  { %194 = vmatpush.bf16.msra.mxu1 %v306_v26 }
  0x24   :  { %180 = vmatpush.bf16.msra.mxu0 %v302_v31 }
  0x26   :  { %195 = vmatpush.bf16.msra.mxu1 %v298_v32 }
  0x28   :  { %181 = vmatpush.bf16.msra.mxu0 %v294_v37 }
  0x2a   :  { %196 = vmatpush.bf16.msra.mxu1 %v290_v38 }
  0x2c   :  { %182 = vmatpush.bf16.msra.mxu0 %v286_v43 }
  0x2e   :  { %197 = vmatpush.bf16.msra.mxu1 %v282_v44 }
  0x30   :  { %183 = vmatpush.bf16.msra.mxu0 %v278_v48 }
  0x31   :  { %198 = vmatmul.bf16.vlgmr.msra.gmra.mxu1 %v339_v47 }
  0x33   :  { %184 = vmatmul.bf16.vlgmr.msra.gmra.mxu0 %v339_v47 }
  0xae   :  { %v199_v51 = vpop.f32.mrf.mxu1 }
  0xaf   :  { %v226_v52 = vadd.f32 %v222_v50, %v199_v51 }
  0xb0   :  { %v185_v0 = vpop.f32.mrf.mxu0 }
  0xb1   :  { %v231_v53 = vmul.f32 0.044715, %v226_v52  ;;  %v225_v4 = vadd.f32 %v221_v63, %v185_v0  ;;  %v229_v5 = vmul.f32 0.5, %v226_v52 }
  0xb3   :  { %v233_v54 = vmul.f32 %v231_v53, %v226_v52 }
  0xb5   :  { %v235_v55 = vmul.f32 %v233_v54, %v226_v52 }
  0xb6   :  { %v201_v56 = vpop.f32.mrf.mxu1 }
  0xb7   :  { %v228_v57 = vadd.f32 %v222_v50, %v201_v56  ;;  %v237_v58 = vadd.f32 %v235_v55, %v226_v52 }
  0xb8   :  { %v187_v10 = vpop.f32.mrf.mxu0 }
  0xb9   :  { %v232_v59 = vmul.f32 0.044715, %v228_v57  ;;  %v239_v60 = vmul.f32 0.7978846, %v237_v58  ;;  %v230_v11 = vmul.f32 0.5, %v228_v57  ;;  %v227_v13 = vadd.f32 %v221_v63, %v187_v10 }
  0xbb   :  { %v234_v61 = vmul.f32 %v232_v59, %v228_v57  ;;  %364 = vtanh.f32 %v239_v60 }
  0xbd   :  { %v236_v62 = vmul.f32 %v234_v61, %v228_v57 }
  0xbf   :  { %v238_v1 = vadd.f32 %v236_v62, %v228_v57 }
  0xc1   :  { %v365_v2 = vpop.eup %364  ;;  %v240_v3 = vmul.f32 0.7978846, %v238_v1 }
  0xc2   :  { %v243_v6 = vadd.f32 1.0, %v365_v2 }
  0xc3   :  { %366 = vtanh.f32 %v240_v3 }
  0xc4   :  { %v245_v7 = vmul.f32 %v243_v6, %v229_v5 }
  0xc6   :  { %v247_v8 = vmul.f32 %v245_v7, %v225_v4 }
  0xc8   :  { %249 = vst [vmem:[#allocation9] sm:$0xff] %v247_v8 }
  0xc9   :  { %v367_v9 = vpop.eup %366 }
  0xca   :  { %v244_v12 = vadd.f32 1.0, %v367_v9 }
  0xcc   :  { %v246_v14 = vmul.f32 %v244_v12, %v230_v11 }
  0xce   :  { %v248_v15 = vmul.f32 %v246_v14, %v227_v13 }
  0xd0   :  { %250 = vst [vmem:[#allocation9 + $0x8] sm:$0xff] %v248_v15 }
  0xd1   :  { %263 = dma.vmem_to_hbm [thread:$0]  %s256_s29, 256, %s258_s5, [#allocation5], %s471_s20, %s471_s20, %s472_s21  }
  0xd2   :  { %468 = dma.done.wait [#allocation5], 256  }
  0xd3   :  { %469 = vsyncadd [#allocation5], 4294967040 }
  0xd4   :  { %268 = vsyncpa [#allocation4], 1 }
  0xd5   :  { %269 = vsyncpa [#allocation7], 1 }
  0xd6   :  { %270 = vsyncpa [#allocation5], 1 }

</bundles_post_ra>
